<compile_context>
chip_gen: v7x
topology: tpu7x:2x2x1
jax: 0.10.0
libtpu: 0.0.40
codegen_flags: <defaults>
</compile_context>

<pallas_src>
import functools

import jax
import jax.numpy as jnp
from jax.experimental import pallas as pl
from jax.experimental.pallas import tpu as pltpu

LANE = 128
SUB = 8
_TILE_ROWS_CAP = 4096          # ~2 MiB f32 / input tile: on the 85% HBM-roofline plateau
_VMEM_FRACTION = 0.85          # keep the scoped VMEM limit under ~85% of physical
_HEADROOM = 4 << 20


def _vmem_capacity_bytes():
    """Physical VMEM of this TPU generation (64 MiB v7x, 128 MiB v5e/v6e)."""
    try:
        info = pltpu.get_tpu_info()
        cap = getattr(info, "vmem_capacity_bytes", None)
        if cap:
            return int(cap)
    except Exception:
        pass
    return 64 << 20            # conservative (v7x-sized) fallback


def _sublane_multiple(dtype):
    """Native sublane packing: 8 rows (32-bit), 16 (bf16/f16), 32 (int8/fp8)."""
    itemsize = jnp.dtype(dtype).itemsize
    return max(SUB, SUB * (4 // max(1, itemsize)))


# --------------------------------------------------------------------------- #
# Kernels
# --------------------------------------------------------------------------- #
def _single_pass_kernel(p_ref, s_ref, o_ref):
    """One grid step == one batch element; whole (1, R, 128) slab in VMEM."""
    p = jnp.clip(p_ref[...].astype(jnp.float32), 0.0, 1.0)
    s = s_ref[...].astype(jnp.float32)
    # pm == 0 wherever s == 1 (and in any zero-padded tail, where p == 0).
    pm = jnp.where(s != 1.0, p, 0.0)
    num = jnp.sum(pm * s)
    den = jnp.sum(pm * p)
    o_ref[...] = ((num / den) * p).astype(o_ref.dtype)


def _partial_reduce_kernel(p_ref, s_ref, num_ref, den_ref, *,
                           tile_rows, valid_rows, need_row_mask):
    """Phase 1: per-(batch, row-block) partial num/den.  Fully parallel grid."""
    p = jnp.clip(p_ref[...].astype(jnp.float32), 0.0, 1.0)
    s = s_ref[...].astype(jnp.float32)
    mask = s != 1.0
    if need_row_mask:
        # Last row-block may read past the real array; mask those rows out.
        r = pl.program_id(0)
        row = r * tile_rows + jax.lax.broadcasted_iota(jnp.int32, p.shape, 1)
        mask = mask & (row < valid_rows)
    # Keep products inside jnp.where so garbage (possibly NaN/Inf) in padded
    # rows can never leak into the sums.
    num_ref[...] = jnp.sum(jnp.where(mask, p * s, 0.0)).reshape(1, 1, 1, 1)
    den_ref[...] = jnp.sum(jnp.where(mask, p * p, 0.0)).reshape(1, 1, 1, 1)


def _apply_kernel(scale_smem, p_ref, o_ref):
    """Phase 2: out = scale[i] * clip(p), tiled, lane-dense output."""
    scale = scale_smem[pl.program_id(0)]
    p = jnp.clip(p_ref[...].astype(jnp.float32), 0.0, 1.0)
    o_ref[...] = (p * scale).astype(o_ref.dtype)


# --------------------------------------------------------------------------- #
# Wrapper
# --------------------------------------------------------------------------- #
def illuminance_correct(predict, source, *, force_tiled=False,
                        tile_rows=_TILE_ROWS_CAP):
    """predict: (N, C, H, W); source: (N or 1, C, H, W). Returns (N, C, H, W)."""
    N, C, H, W = predict.shape
    Ns = source.shape[0]
    assert Ns in (1, N)

    dtype = predict.dtype
    itemsize = jnp.dtype(dtype).itemsize
    sub = _sublane_multiple(dtype)
    L = C * H * W

    # Lane-dense flattening.  When L % 128 == 0 this is a pure metadata reshape
    # (no HBM copy).  Otherwise zero-pad: padded p == 0 kills both num/den
    # contributions and the padded output region is sliced off.
    pad = 0 if (L % LANE == 0) else (-L) % (sub * LANE)
    Lp = L + pad
    R = Lp // LANE

    p2 = predict.reshape(N, L)
    s2 = source.reshape(Ns, L)
    if pad:
        p2 = jnp.pad(p2, ((0, 0), (0, pad)))
        s2 = jnp.pad(s2, ((0, 0), (0, pad)))
    p2 = p2.reshape(N, R, LANE)
    s2 = s2.reshape(Ns, R, LANE)

    budget = int(_VMEM_FRACTION * _vmem_capacity_bytes())

    # Fast-path sizing: 2-buffered p + out + source (source counted 2-buffered
    # so the Buffered(1) fallback is always safe) + ~5 live f32 slab temps.
    slab_dt = R * LANE * itemsize
    slab_f32 = R * LANE * 4
    fast_need = 6 * slab_dt + 5 * slab_f32 + _HEADROOM
    use_fast = (not force_tiled) and (fast_need <= budget)

    if use_fast:
        # ---- single-pass whole-slab path (one HBM traversal of p, s, out) ---- #
        vmem = int(min(budget, max(fast_need, 16 << 20)))
        src_map = (lambda i: (0, 0, 0)) if Ns == 1 else (lambda i: (i, 0, 0))

        def run_fast(single_buffer_src):
            if single_buffer_src:
                src_spec = pl.BlockSpec((1, R, LANE), src_map,
                                        pipeline_mode=pl.Buffered(1))
            else:
                src_spec = pl.BlockSpec((1, R, LANE), src_map)
            return pl.pallas_call(
                _single_pass_kernel,
                out_shape=jax.ShapeDtypeStruct((N, R, LANE), dtype),
                grid=(N,),
                in_specs=[pl.BlockSpec((1, R, LANE), lambda i: (i, 0, 0)),
                          src_spec],
                out_specs=pl.BlockSpec((1, R, LANE), lambda i: (i, 0, 0)),
                compiler_params=pltpu.CompilerParams(
                    dimension_semantics=("parallel",),
                    vmem_limit_bytes=vmem),
            )(p2, s2)

        if Ns == 1 and hasattr(pl, "Buffered"):
            # Broadcast source: constant block index -> fetched once; a single
            # buffer reclaims one slab of VMEM (matters most under v7x 64 MiB).
            try:
                out = run_fast(True)
            except Exception:
                out = run_fast(False)
        else:
            out = run_fast(False)
    else:
        # ---- tiled two-phase path (large images; bounded VMEM) ---- #
        # Phase-1 row tile: multiple of the dtype's sublane packing, capped by
        # the VMEM budget (2-buffered p+s in dtype + ~5 f32 tile temporaries).
        cap_rows = max(sub, (int(tile_rows) // sub) * sub)
        per_row = LANE * (4 * itemsize + 5 * 4)
        budget_rows = max(sub, int((budget - _HEADROOM) // per_row) // sub * sub)
        cap_rows = min(cap_rows, budget_rows)
        TR = R if R <= cap_rows else cap_rows
        nb = pl.cdiv(R, TR)
        need_row_mask = (R % TR) != 0

        tile_dt = TR * LANE * itemsize
        tile_f32 = TR * LANE * 4
        vmem1 = int(min(budget,
                        max(4 * tile_dt + 5 * tile_f32 + _HEADROOM, 24 << 20)))

        # Batch is the INNER grid axis: with a broadcast source (Ns == 1) the
        # source block index is constant across consecutive steps, so Pallas
        # DMAs each source tile once per row block (R rows total, not N*R).
        src_map = (lambda r, i: (0, r, 0)) if Ns == 1 else (lambda r, i: (i, r, 0))

        reduce_kernel = functools.partial(
            _partial_reduce_kernel, tile_rows=TR, valid_rows=R,
            need_row_mask=need_row_mask)

        pnum, pden = pl.pallas_call(
            reduce_kernel,
            out_shape=(jax.ShapeDtypeStruct((N, nb, 1, 1), jnp.float32),
                       jax.ShapeDtypeStruct((N, nb, 1, 1), jnp.float32)),
            grid=(nb, N),
            in_specs=[pl.BlockSpec((1, TR, LANE), lambda r, i: (i, r, 0)),
                      pl.BlockSpec((1, TR, LANE), src_map)],
            out_specs=(pl.BlockSpec((1, 1, 1, 1), lambda r, i: (i, r, 0, 0)),
                       pl.BlockSpec((1, 1, 1, 1), lambda r, i: (i, r, 0, 0))),
            compiler_params=pltpu.CompilerParams(
                # Fully parallel (no carried state): on v7x both TensorCores
                # can split the row reduction even when N == 1.
                dimension_semantics=("parallel", "parallel"),
                vmem_limit_bytes=vmem1),
        )(p2, s2)

        # Tiny (N, nb) combine + divide in plain XLA (negligible traffic).
        num = jnp.sum(pnum, axis=(1, 2, 3))
        den = jnp.sum(pden, axis=(1, 2, 3))
        scale = num / den                       # den==0 -> NaN/Inf (PyTorch parity)

        # Phase 2 streams only p in/out (no source), so it can use a 2x larger
        # row tile for the same VMEM footprint, halving per-step overhead.
        TR2 = min(R, 2 * TR)
        if 4 * TR2 * LANE * itemsize + 3 * TR2 * LANE * 4 + _HEADROOM > budget:
            TR2 = TR
        nb2 = pl.cdiv(R, TR2)
        vmem2 = int(min(budget,
                        max(4 * TR2 * LANE * itemsize + 3 * TR2 * LANE * 4
                            + _HEADROOM, 24 << 20)))

        out = pl.pallas_call(
            _apply_kernel,
            out_shape=jax.ShapeDtypeStruct((N, R, LANE), dtype),
            grid=(N, nb2),
            in_specs=[pl.BlockSpec(memory_space=pltpu.MemorySpace.SMEM),
                      pl.BlockSpec((1, TR2, LANE), lambda i, r: (i, r, 0))],
            out_specs=pl.BlockSpec((1, TR2, LANE), lambda i, r: (i, r, 0)),
            compiler_params=pltpu.CompilerParams(
                dimension_semantics=("parallel", "parallel"),
                vmem_limit_bytes=vmem2),
        )(scale, p2)

    if pad:
        out = out.reshape(N, Lp)[:, :L]
    return out.reshape(N, C, H, W)


# --------------------------------------------------------------------------- #
# Pure-JAX reference mirroring the PyTorch forward
# --------------------------------------------------------------------------- #
def _reference(predict, source):
    N = predict.shape[0]
    Ns = source.shape[0]
    outs = []
    for i in range(N):
        p = jnp.clip(predict[i], 0.0, 1.0)
        s = source[i] if Ns != 1 else source[0]
        mask = s != 1.0
        num = jnp.sum(jnp.where(mask, p * s, 0.0))
        den = jnp.sum(jnp.where(mask, p * p, 0.0))
        outs.append((num / den) * p)
    return jnp.stack(outs, axis=0)


def _check(out, ref, atol=1e-5, rtol=1e-4):
    assert out.shape == ref.shape
    assert jnp.allclose(out.astype(jnp.float32), ref.astype(jnp.float32),
                        atol=atol, rtol=rtol), (
        float(jnp.max(jnp.abs(out.astype(jnp.float32) - ref.astype(jnp.float32)))))


if __name__ == "__main__":
    key = jax.random.PRNGKey(0)
    k1, k2, k3, k4, k5, k6 = jax.random.split(key, 6)

    # 1) fast path (L % 128 == 0, no pad, no wrapper copies)
    N, C, H, W = 2, 4, 16, 16
    predict = jax.random.uniform(k1, (N, C, H, W), jnp.float32, -0.2, 1.2)
    source = jax.random.uniform(k2, (N, C, H, W), jnp.float32, 0.0, 2.0)
    source = source.at[:, 0, :4, :4].set(1.0)   # make the !=1 mask matter
    out = jax.block_until_ready(illuminance_correct(predict, source))
    _check(out, _reference(predict, source))

    # 2) broadcast-source fast path (source batch == 1, Buffered(1) attempt)
    out_b = jax.block_until_ready(illuminance_correct(predict, source[:1]))
    _check(out_b, _reference(predict, source[:1]))

    # 3) tiled two-phase path (forced), multiple row-blocks, exact tiling,
    #    broadcast source (exercises the once-per-row-block source dedup)
    p3 = jax.random.uniform(k3, (2, 4, 32, 16), jnp.float32, -0.2, 1.2)
    s3 = jax.random.uniform(k4, (1, 4, 32, 16), jnp.float32, 0.0, 2.0)
    s3 = s3.at[:, 0, :4, :4].set(1.0)
    out3 = jax.block_until_ready(
        illuminance_correct(p3, s3, force_tiled=True, tile_rows=8))
    _check(out3, _reference(p3, s3))

    # 4) tiled path with a partial (masked) boundary row-block, N == 1
    p4 = jax.random.uniform(k5, (1, 5, 16, 16), jnp.float32, -0.2, 1.2)
    s4 = jax.random.uniform(k6, (1, 5, 16, 16), jnp.float32, 0.0, 2.0)
    s4 = s4.at[:, 0, :4, :4].set(1.0)
    out4 = jax.block_until_ready(
        illuminance_correct(p4, s4, force_tiled=True, tile_rows=8))
    _check(out4, _reference(p4, s4))

    # 5) odd size needing the zero-pad fallback (L % 128 != 0)
    p5 = jax.random.uniform(k1, (2, 3, 7, 5), jnp.float32, -0.2, 1.2)
    s5 = jax.random.uniform(k2, (2, 3, 7, 5), jnp.float32, 0.0, 2.0)
    s5 = s5.at[:, 0, :2, :2].set(1.0)
    out5 = jax.block_until_ready(illuminance_correct(p5, s5))
    _check(out5, _reference(p5, s5))

    # 6) bf16 tiled path (16-row sublane packing, masked boundary block)
    p6 = jax.random.uniform(k3, (2, 4, 48, 16), jnp.float32, -0.2, 1.2).astype(jnp.bfloat16)
    s6 = jax.random.uniform(k4, (2, 4, 48, 16), jnp.float32, 0.0, 2.0).astype(jnp.bfloat16)
    s6 = s6.at[:, 0, :4, :4].set(1.0)
    out6 = jax.block_until_ready(
        illuminance_correct(p6, s6, force_tiled=True, tile_rows=16))
    ref6 = _reference(p6.astype(jnp.float32), s6.astype(jnp.float32))
    _check(out6, ref6, atol=3e-2, rtol=3e-2)

    print("KERNEL_OK")
</pallas_src>

<mosaic_0001>
module attributes {stable_mosaic.version = 11 : i64} {
  func.func @_single_pass_kernel(%arg0: i32, %arg1: memref<1x8x128xf32, #tpu.memory_space<vmem>>, %arg2: memref<1x8x128xf32, #tpu.memory_space<vmem>>, %arg3: memref<1x8x128xf32, #tpu.memory_space<vmem>>) attributes {dimension_semantics = [#tpu.dimension_semantics<parallel>], iteration_bounds = array<i64: 2>, scalar_prefetch = 0 : i64, scratch_operands = 0 : i64, tpu.core_type = #tpu.core_type<tc>, window_params = [{transform_indices = @transform_0, window_bounds = array<i64: 1, 8, 128>}, {transform_indices = @transform_1, window_bounds = array<i64: 1, 8, 128>}, {transform_indices = @transform_2, window_bounds = array<i64: 1, 8, 128>}]} {
    %c0 = arith.constant 0 : index
    %c0_0 = arith.constant 0 : index
    %c0_1 = arith.constant 0 : index
    %0 = vector.load %arg1[%c0, %c0_0, %c0_1] : memref<1x8x128xf32, #tpu.memory_space<vmem>>, vector<1x8x128xf32>
    %cst = arith.constant 0.000000e+00 : f32
    %cst_2 = arith.constant 1.000000e+00 : f32
    %1 = vector.broadcast %cst : f32 to vector<1x8x128xf32>
    %2 = arith.maximumf %1, %0 : vector<1x8x128xf32>
    %3 = vector.broadcast %cst_2 : f32 to vector<1x8x128xf32>
    %4 = arith.minimumf %3, %2 : vector<1x8x128xf32>
    %c0_3 = arith.constant 0 : index
    %c0_4 = arith.constant 0 : index
    %c0_5 = arith.constant 0 : index
    %5 = vector.load %arg2[%c0_3, %c0_4, %c0_5] : memref<1x8x128xf32, #tpu.memory_space<vmem>>, vector<1x8x128xf32>
    %cst_6 = arith.constant 1.000000e+00 : f32
    %6 = vector.broadcast %cst_6 : f32 to vector<1x8x128xf32>
    %7 = arith.cmpf one, %5, %6 : vector<1x8x128xf32>
    %cst_7 = arith.constant 0.000000e+00 : f32
    %8 = vector.broadcast %cst_7 : f32 to vector<1x8x128xf32>
    %9 = arith.select %7, %4, %8 : vector<1x8x128xi1>, vector<1x8x128xf32>
    %10 = arith.mulf %9, %5 : vector<1x8x128xf32>
    %11 = vector.shape_cast %10 : vector<1x8x128xf32> to vector<1x1x8x128xf32>
    %cst_8 = arith.constant dense<0.000000e+00> : vector<1xf32>
    %12 = vector.multi_reduction <add>, %11, %cst_8 [1, 2, 3] : vector<1x1x8x128xf32> to vector<1xf32>
    %13 = vector.shape_cast %12 : vector<1xf32> to vector<1x1x1x1xf32>
    %14 = vector.extract %13[0, 0, 0, 0] : f32 from vector<1x1x1x1xf32>
    %15 = arith.mulf %9, %4 : vector<1x8x128xf32>
    %16 = vector.shape_cast %15 : vector<1x8x128xf32> to vector<1x1x8x128xf32>
    %cst_9 = arith.constant dense<0.000000e+00> : vector<1xf32>
    %17 = vector.multi_reduction <add>, %16, %cst_9 [1, 2, 3] : vector<1x1x8x128xf32> to vector<1xf32>
    %18 = vector.shape_cast %17 : vector<1xf32> to vector<1x1x1x1xf32>
    %19 = vector.extract %18[0, 0, 0, 0] : f32 from vector<1x1x1x1xf32>
    %20 = arith.divf %14, %19 : f32
    %21 = vector.broadcast %20 : f32 to vector<1x8x128xf32>
    %22 = arith.mulf %21, %4 : vector<1x8x128xf32>
    %c0_10 = arith.constant 0 : index
    %c0_11 = arith.constant 0 : index
    %c0_12 = arith.constant 0 : index
    %23 = vector.load %arg3[%c0_10, %c0_11, %c0_12] : memref<1x8x128xf32, #tpu.memory_space<vmem>>, vector<1x8x128xf32>
    tpu.vector_store %arg3[%c0_10, %c0_11, %c0_12], %22 {strides = array<i32>} : memref<1x8x128xf32, #tpu.memory_space<vmem>>, vector<1x8x128xf32>,
    return
  }
  func.func @transform_0(%arg0: i32) -> (i32, i32, i32) {
    %c0_i32 = arith.constant 0 : i32
    %c0_i32_0 = arith.constant 0 : i32
    %c0_i32_1 = arith.constant 0 : i32
    return %arg0, %c0_i32, %c0_i32_0 : i32, i32, i32
  }
  func.func @transform_1(%arg0: i32) -> (i32, i32, i32) {
    %c0_i32 = arith.constant 0 : i32
    %c0_i32_0 = arith.constant 0 : i32
    %c0_i32_1 = arith.constant 0 : i32
    return %arg0, %c0_i32, %c0_i32_0 : i32, i32, i32
  }
  func.func @transform_2(%arg0: i32) -> (i32, i32, i32) {
    %c0_i32 = arith.constant 0 : i32
    %c0_i32_0 = arith.constant 0 : i32
    %c0_i32_1 = arith.constant 0 : i32
    return %arg0, %c0_i32, %c0_i32_0 : i32, i32, i32
  }
}

</mosaic_0001>

<bundles_post_ra>
// kernel: tpu_custom_call.1
= control target key start
LH: loop header
LB: loop body
LE: loop exit
PB: predicated region body
PF: predicated region fallthrough
CT: control target
= control target key end

     0   :  { %7 = vsyncpa [#allocation3], 0  ;;  %s774_s0 = inlined_call_operand.hbm [shape: f32[2,8,128], index: 0, kind: input, shape index: {}]   ;;  %s775_s1 = inlined_call_operand.hbm [shape: f32[2,8,128], index: 1, kind: input, shape index: {}]   ;;  %s776_s2 = inlined_call_operand.hbm [shape: f32[2,8,128], index: 2, kind: output, shape index: {}]  }
   0x1   :  { %9 = vsyncpa [#allocation3 + $0x1], 0 }
   0x2   :  { %10 = vsyncpa [#allocation6], 0 }
   0x3   :  { %12 = vsyncpa [#allocation6 + $0x1], 0 }
   0x4   :  { %13 = vsyncpa [#allocation4], 0 }
   0x5   :  { %15 = vsyncpa [#allocation4 + $0x1], 0  ;;  %s560_s9 = smov 0   ;;  %s562_s10 = smov 0  }
   0x6   :  { %s564_s11 = smov 0   ;;  %s566_s12 = smov 0  }
   0x7 LB: > { %s581_s13 = sadd.s32 4294967295, %s540_s12   ;;  %s336_s14 = sadd.s32 4294967294, %s540_s12   ;;  %s540_s12 = sphi %s566_s12, %s795_s12   ;;  %s536_s11 = sphi %s564_s11, %s794_s11   ;;  %s532_s10 = sphi %s562_s10, %s793_s10   ;;  %s528_s9 = sphi %s560_s9, %s792_s9  }
   0x8   : > { %s585_s15 = sadd.s32 1, %s540_s12   ;;  %s28_s16 = sadd.s32 1, %s536_s11 }
   0x9   : > { %s25_s17 = ssub.s32 %s540_s12, %s585_s15  ;;  %p35_p0 = scmp.ne.s32.totalorder %s536_s11, %s532_s10 }
   0xa   : > { %p26_p1 = scmp.eq.s32.totalorder %s25_s17, 0  ;;  %p36_p2 = scmp.eq.s32.totalorder %s540_s12, 0 }
   0xb   : > { %p41_p3 = scmp.ne.s32.totalorder %s532_s10, %s528_s9  ;;  %p42_p4 = scmp.eq.s32.totalorder %s581_s13, 0 }
   0xc   : > { %s597_s18 = scalar_select %p26_p1, %s536_s11, %s28_s16  }
   0xd   : > { %p599_p5 = por %p36_p2, %p35_p0  ;;  %p603_p6 = por %p42_p4, %p41_p3 }
   0xe   : > { %p91_p7 = scmp.eq.s32.totalorder %s581_s13, 1  ;;  %p97_p8 = scmp.eq.s32.totalorder %s336_s14, 1 }
   0xf   : > { %s780_s20 = scalar_select %p603_p6, 1, 0 }
  0x10   : > { %p374_p10 = scmp.lt.s32.totalorder %s540_s12, 2  ;;  %p610_p11 = por %p91_p7, %p35_p0 }
  0x11   : > { %p614_p12 = por %p97_p8, %p41_p3  ;;  %s619_s23 = sand.u32 1, %s536_s11  }
  0x12   : > { %s781_s21 = scalar_select %p610_p11, 1, 0 }
  0x13   : > { %s782_s22 = scalar_select %p614_p12, 1, 0 }
  0x14   : > { %s340_s24 = sshll.u32 %s540_s12, 7  ;;  %s339_s25 = sshll.u32 %s619_s23, 3 }
  0x15   : > { %s628_s28 = scalar_lea.hbm %s774_s0, %s340_s24  ;;  %s121_s29 = scalar_lea.vmem [#allocation2], %s339_s25 }
  0x16   : > { %s128_s30 = sshll.u32 %s121_s29, 4  ;;  %p634_p13 = pnand %p374_p10, %p599_p5  ;;  %s638_s30 = int_to_ptr.vmem [resolvable:$true] %s128_s30 }
  0x17   : > { %s118_s4 = scalar_lea.sflag [#allocation3], %s619_s23  ;;  %s410_s5 = scalar_lea.hbm %s628_s28, 128 }
  0x18   : > { %p411_p2 = scmp.ne.s32.totalorder %s628_s28, %s410_s5  ;;  %p412_p3 = pneg %p634_p13 }
  0x19   : > { %s415_s8 = scalar_lea.hbm %s774_s0, 256  ;;  %p416_p5 = scmp.lt.u32.totalorder %s628_s28, %s774_s0 }
  0x1a   : > { %p413_p4 = pnand %p412_p3, %p411_p2  ;;  %p417_p8 = scmp.lt.u32.totalorder %s415_s8, %s410_s5 }
  0x1b   : > { %p419_p9 = scmp.lt.u32.totalorder %s410_s5, %s628_s28 }
  0x1c   : > { %p414_p7 = pneg %p413_p4  ;;  %p418_p10 = por %p417_p8, %p416_p5 }
  0x1e   : > { %p420_p0 = por %p419_p9, %p418_p10 }
  0x20   : > { %p421_p1 = pnand %p420_p0, %p414_p7 }
  0x22   : > { %424 = shalt.err (!%p421_p1)
}
  0x23   : > { %s425_s17 = scalar_lea.vmem %s638_s30, 128  ;;  %s542_s19 = smov [#allocation2]  }
  0x24   : > { %p426_p2 = scmp.ne.s32.totalorder %s638_s30, %s425_s17  ;;  %s430_s26 = sshll.u32 %s542_s19, 4  ;;  %s431_s26 = int_to_ptr.vmem [resolvable:$false] %s430_s26 }
  0x25   : > { %s432_s27 = scalar_lea.vmem %s431_s26, 256  ;;  %p433_p11 = scmp.lt.s32.totalorder %s638_s30, %s431_s26 }
  0x26   : > { %p428_p4 = pnand %p426_p2, %p412_p3  ;;  %p434_p5 = scmp.lt.s32.totalorder %s432_s27, %s425_s17 }
  0x28   : > { %p429_p12 = pneg %p428_p4  ;;  %p435_p8 = por %p434_p5, %p433_p11 }
  0x2a   : > { %p436_p9 = pnand %p435_p8, %p429_p12 }
  0x2c   : > { %439 = shalt.err (!%p436_p9)
}
  0x2d   : > { %366 = dma.hbm_to_vmem [thread:$0]  (!%p634_p13), %s628_s28, 128, %s638_s30, %s118_s4  }
  0x2e   : > { %p784_p0 = scmp.lt.s32.totalorder %s540_s12, 3  ;;  %p785_p1 = scmp.ge.s32.totalorder %s540_s12, 1 }
  0x2f   : > { %s681_s7 = scalar_lea.hbm %s775_s1, %s340_s24  ;;  %s139_s8 = scalar_lea.vmem [#allocation5], %s339_s25 }
  0x30   : > { %p672_p7 = pnand %p785_p1, %p784_p0  ;;  %s146_s14 = sshll.u32 %s139_s8, 4  ;;  %s147_s14 = int_to_ptr.vmem [resolvable:$true] %s146_s14 }
  0x31   : > { %s136_s28 = scalar_lea.sflag [#allocation6], %s619_s23  ;;  %s440_s30 = scalar_lea.hbm %s681_s7, 128 }
  0x32   : > { %s786_s29 = scalar_select %p672_p7, 1, 0 }
  0x33   : > { %p441_p11 = scmp.ne.s32.totalorder %s681_s7, %s440_s30  ;;  %s445_s24 = scalar_lea.hbm %s775_s1, 256 }
  0x34   : > { %p446_p2 = scmp.lt.u32.totalorder %s681_s7, %s775_s1  ;;  %p447_p4 = scmp.lt.u32.totalorder %s445_s24, %s440_s30 }
  0x35   : > { %p443_p12 = pnand %p441_p11, %p412_p3  ;;  %p449_p8 = scmp.lt.u32.totalorder %s440_s30, %s681_s7 }
  0x36   : > { %p448_p5 = por %p447_p4, %p446_p2 }
  0x37   : > { %p444_p10 = pneg %p443_p12 }
  0x38   : > { %p450_p9 = por %p449_p8, %p448_p5 }
  0x3a   : > { %p451_p0 = pnand %p450_p9, %p444_p10 }
  0x3c   : > { %454 = shalt.err (!%p451_p0)
}
  0x3d   : > { %s455_s23 = scalar_lea.vmem %s147_s14, 128  ;;  %s543_s25 = smov [#allocation5]  }
  0x3e   : > { %p456_p1 = scmp.ne.s32.totalorder %s147_s14, %s455_s23  ;;  %s460_s26 = sshll.u32 %s543_s25, 4  ;;  %s461_s26 = int_to_ptr.vmem [resolvable:$false] %s460_s26 }
  0x3f   : > { %s462_s27 = scalar_lea.vmem %s461_s26, 256  ;;  %p463_p6 = scmp.lt.s32.totalorder %s147_s14, %s461_s26 }
  0x40   : > { %p458_p11 = pnand %p456_p1, %p412_p3  ;;  %p464_p7 = scmp.lt.s32.totalorder %s462_s27, %s455_s23 }
  0x42   : > { %p459_p12 = pneg %p458_p11  ;;  %p465_p2 = por %p464_p7, %p463_p6 }
  0x44   : > { %p466_p4 = pnand %p465_p2, %p459_p12 }
  0x46   : > { %469 = shalt.err (!%p466_p4)
}
  0x47   : > { %369 = dma.hbm_to_vmem [thread:$0]  (!%p634_p13), %s681_s7, 128, %s147_s14, %s136_s28  }
  0x48   : > { %p787_p10 = scmp.ne.s32.totalorder %s786_s29, 0 }
  0x49   : > { %s708_s5 = sand.u32 (!%p787_p10), 1, %s532_s10   ;;  %p788_p6 = scmp.ne.s32.totalorder (!%p787_p10), %s780_s20, 0 }
  0x4a   : > { %155 = sbr.rel (%p787_p10) target bundleno = 381 (0x17d), region = 28  ;;  %s711_s6 = sshll.u32 (!%p787_p10), %s708_s5, 3 }
  0x4b   : > { %s158_s8 = scalar_lea.sflag (!%p787_p10), [#allocation3], %s708_s5  ;;  %s161_s30 = scalar_lea.vmem (!%p787_p10), [#allocation2], %s711_s6 }
  0x51   : > { %515 = dma.done.wait (%p788_p6), %s158_s8, 128  }
  0x52   : > { %517 = vsyncadd (%p788_p6), %s158_s8, 4294967168  ;;  %s167_s3 = scalar_lea.sflag [#allocation6], %s708_s5  ;;  %s170_s29 = scalar_lea.vmem [#allocation5], %s711_s6 }
  0x53   : > { %519 = dma.done.wait (%p788_p6), %s167_s3, 128  }
  0x54   : > { %521 = vsyncadd (%p788_p6), %s167_s3, 4294967168  ;;  %v196_v0 = vld [vmem:[%s161_s30] sm:$0xff]  ;;  %v199_v1 = vld [vmem:[%s170_s29] sm:$0xff]  ;;  %s348_s28 = sshll.u32 %s581_s13, 7  ;;  %s195_s16 = scalar_lea.vmem [#allocation7], %s711_s6 }
  0x55   : > { %v197_v2 = vmax.f32 %v196_v0, 0.0  ;;  %vm200_vm0 = vcmp.ne.f32.partialorder %v199_v1, 1.0  ;;  %s243_s24 = sshll.u32 %s195_s16, 4  ;;  %s730_s23 = scalar_lea.hbm %s776_s2, %s348_s28  ;;  %s732_s24 = int_to_ptr.vmem [resolvable:$true] %s243_s24 }
  0x56   : > { %s230_s25 = scalar_lea.sflag [#allocation4], %s708_s5  ;;  %s470_s26 = scalar_lea.vmem %s732_s24, 128 }
  0x57   : > { %v198_v3 = vmin.f32 %v197_v2, 1.0  ;;  %p471_p13 = scmp.ne.s32.totalorder %s732_s24, %s470_s26  ;;  %p789_p3 = scmp.ne.s32.totalorder %s781_s21, 0 }
  0x58   : > { %s544_s13 = smov [#allocation7]  }
  0x59   : > { %v201_v4 = vsel %vm200_vm0, %v198_v3, 0.0  ;;  %p472_p7 = pnand %p471_p13, %p789_p3  ;;  %s474_s27 = sshll.u32 %s544_s13, 4  ;;  %s475_s27 = int_to_ptr.vmem [resolvable:$false] %s474_s27 }
  0x5a   : > { %v202_v5 = vmul.f32 %v201_v4, %v199_v1  ;;  %v212_v6 = vmul.f32 %v201_v4, %v198_v3  ;;  %s476_s6 = scalar_lea.vmem %s475_s27, 256  ;;  %p477_p8 = scmp.lt.s32.totalorder %s732_s24, %s475_s27 }
  0x5b   : > { %p473_p5 = pneg %p472_p7  ;;  %p478_p9 = scmp.lt.s32.totalorder %s476_s6, %s470_s26 }
  0x5c   : > { %203 = vadd.xlane.f32.xlu0 %v202_v5 }
  0x5d   : > { %p479_p0 = por %p478_p9, %p477_p8 }
  0x5f   : > { %p480_p1 = pnand %p479_p0, %p473_p5 }
  0x60   : > { %213 = vadd.xlane.f32.xlu0 %v212_v6 }
  0xe9   : > { %v204_v7 = vpop.xlane.xlu0 %203 }
  0xea   : > { %v205_v8 = vrot.slane %v204_v7, 4 }
  0xec   : > { %v206_v9 = vadd.f32 %v205_v8, %v204_v7 }
  0xed   : > { %v214_v10 = vpop.xlane.xlu0 %213 }
  0xee   : > { %v207_v11 = vrot.slane %v206_v9, 2  ;;  %v215_v12 = vrot.slane %v214_v10, 4 }
  0xf0   : > { %v216_v13 = vadd.f32 %v215_v12, %v214_v10  ;;  %v208_v14 = vadd.f32 %v207_v11, %v206_v9 }
  0xf2   : > { %v217_v15 = vrot.slane %v216_v13, 2  ;;  %v209_v16 = vrot.slane %v208_v14, 1 }
  0xf4   : > { %v218_v17 = vadd.f32 %v217_v15, %v216_v13  ;;  %v210_v18 = vadd.f32 %v209_v16, %v208_v14 }
  0xf6   : > { %351 = vpush %v210_v18  ;;  %v219_v19 = vrot.slane %v218_v17, 1 }
  0xf8   : > { %v220_v20 = vadd.f32 %v219_v19, %v218_v17 }
  0xfa   : > { %353 = vpush %v220_v20 }
 0x127   : > { %s352_s20 = spop %351 }
 0x12b   : > { %s354_s7 = spop %353 }
 0x12c   : > { %v222_v21 = vstv %s354_s7 }
 0x12d   : > { %408 = vrcp.f32 %v222_v21 }
 0x137   : > { %v409_v22 = vpop.eup %408 }
 0x138   : > { %355 = vpush %v409_v22 }
 0x169   : > { %s356_s14 = spop %355 }
 0x16a   : > { %s225_s4 = smul.f32 %s356_s14, %s352_s20 }
 0x16c   : > { %v226_v23 = vstv %s225_s4 }
 0x16d   : > { %v227_v24 = vmul.f32 %v226_v23, %v198_v3 }
 0x16f   : > { %228 = vst [vmem:[%s195_s16] sm:$0xff] %v227_v24 }
 0x170   : > { %483 = shalt.err (!%p480_p1)
}
 0x171   : > { %s484_s5 = scalar_lea.hbm %s730_s23, 128  ;;  %s488_s3 = scalar_lea.hbm %s776_s2, 256 }
 0x172   : > { %p485_p11 = scmp.ne.s32.totalorder %s730_s23, %s484_s5  ;;  %p489_p4 = scmp.lt.u32.totalorder %s730_s23, %s776_s2 }
 0x173   : > { %p490_p10 = scmp.lt.u32.totalorder %s488_s3, %s484_s5  ;;  %p492_p13 = scmp.lt.u32.totalorder %s484_s5, %s730_s23 }
 0x174   : > { %p486_p12 = pnand %p485_p11, %p789_p3 }
 0x175   : > { %p491_p6 = por %p490_p10, %p489_p4 }
 0x176   : > { %p487_p2 = pneg %p486_p12 }
 0x177   : > { %p493_p7 = por %p492_p13, %p491_p6 }
 0x179   : > { %p494_p5 = pnand %p493_p7, %p487_p2 }
 0x17b   : > { %497 = shalt.err (!%p494_p5)
}
 0x17c   : > { %361 = dma.vmem_to_hbm [thread:$0]  (%p789_p3), %s732_s24, 128, %s730_s23, %s230_s25  }
 0x17d PF: > { %s255_s7 = sand.u32 1, %s528_s9   ;;  %p790_p8 = scmp.ne.s32.totalorder %s782_s22, 0 }
 0x17e   : > { %p791_p9 = scmp.ge.s32.totalorder %s540_s12, 2  ;;  %s256_s14 = scalar_lea.sflag [#allocation4], %s255_s7 }
 0x180   : > { %p371_p0 = pnand %p791_p9, %p790_p8 }
 0x182   : > { %523 = dma.done.wait (!%p371_p0), %s256_s14, 128  }
 0x183   : > { %525 = vsyncadd (!%p371_p0), %s256_s14, 4294967168  ;;  %p18_p1 = scmp.ge.s32.totalorder %s585_s15, 4   ;;  %s792_s9 = smov %s532_s10 }
 0x184   : > { %s793_s10 = smov %s536_s11  ;;  %s794_s11 = smov %s597_s18 }
 0x185   : > { %s795_s12 = smov %s585_s15  ;;  %20 = sbr.rel (!%p18_p1) target bundleno = 7 (0x7), region = 86 }
 0x18c   :  { %261 = vsyncpa [#allocation3], 1 }
 0x18d   :  { %263 = vsyncpa [#allocation3 + $0x1], 1 }
 0x18e   :  { %264 = vsyncpa [#allocation6], 1 }
 0x18f   :  { %266 = vsyncpa [#allocation6 + $0x1], 1 }
 0x190   :  { %267 = vsyncpa [#allocation4], 1 }
 0x191   :  { %269 = vsyncpa [#allocation4 + $0x1], 1 }

</bundles_post_ra>
